<compile_context>
chip_gen: v7x
topology: tpu7x:2x2x1
jax: 0.10.0
libtpu: 0.0.40
codegen_flags: <defaults>
</compile_context>

<pallas_src>
import functools

import jax
import jax.numpy as jnp
from jax import lax
from jax.experimental import pallas as pl
from jax.experimental.pallas import tpu as pltpu


_LANE = 128
_SUBLANE = 8
_TARGET_GRID_STEPS = 8                 # amortize ~0.35us/step + deep pipelining
_DEFAULT_TILE_BUDGET_BYTES = 8 << 20   # fits v5e 16 MiB scoped default w/ headroom


def _padded_tile_bytes(rows, cols, itemsize=4):
    """VMEM bytes of one (rows, cols) f32 tile after (8, 128) layout padding."""
    r = pl.cdiv(rows, _SUBLANE) * _SUBLANE
    c = pl.cdiv(cols, _LANE) * _LANE
    return r * c * itemsize


def _gcn_kernel(nodes_ref, edges_ref, w_ref, b_ref, out_ref, *, mxu_dtype):
    # nodes_ref: (Bt, N, F_in)   edges_ref: (Bt, N, N)
    # w_ref:     (F_in, F_out)   b_ref:     (1, F_out)
    # out_ref:   (Bt, N, F_out)
    bt, n, f_in = nodes_ref.shape
    f_out = w_ref.shape[1]

    # Single tall (Bt*N, F_in) @ (F_in, F_out) MXU projection.  N is a
    # multiple of 8, so collapsing the leading dims is layout-free.
    x = nodes_ref[...].astype(mxu_dtype).reshape(bt * n, f_in)
    w = w_ref[...].astype(mxu_dtype)
    xw = jnp.dot(x, w, preferred_element_type=jnp.float32)
    xw = (xw + b_ref[...]).reshape(bt, n, f_out)          # bias hoisted, once/step

    # Fully batched normalized aggregation (no per-molecule Python loop).
    a = edges_ref[...]                                    # (Bt, N, N), f32
    deg = jnp.sum(a, axis=-1, keepdims=True) + 1.0        # one XLU reduce; deg of A+I
    dinv = lax.rsqrt(deg)                                 # one EUP rsqrt, f32
    s = dinv * xw                                         # D^{-1/2}(XW + b), f32
    # (A + I) @ S == A @ S + S  -> no eye / a_norm / transpose materialized.
    agg = jnp.einsum(
        "bij,bjk->bik",
        a.astype(mxu_dtype),                              # exact cast (0/1 adjacency)
        s.astype(mxu_dtype),
        preferred_element_type=jnp.float32,
    )
    # Post-matmul elementwise math stays f32 (v5e VPU/EUP have no bf16 path).
    out_ref[...] = jnp.maximum(dinv * (agg + s), 0.0).astype(out_ref.dtype)


def graph_conv_featurizer_forward(
    nodes,
    edges,
    weight,
    bias,
    *,
    batch_block=None,
    vmem_tile_budget_bytes=_DEFAULT_TILE_BUDGET_BYTES,
    mxu_dtype=jnp.float32,
):
    """Pallas equivalent of GraphConvFeaturizer.forward.

    nodes:  (B, N, F_in)  float32
    edges:  (B, N, N)     float32
    weight: (F_in, F_out) float32
    bias:   (F_out,)      float32
    returns (conv_out, edges) with conv_out: (B, N, F_out)
    """
    B, N, F_in = nodes.shape
    F_out = weight.shape[1]

    # Padded, double-buffered per-molecule VMEM footprint (~48 KiB at N=16,
    # F_in=F_out=32): this — not the raw sizes — is what limits Bt.
    per_mol_bytes = 2 * (
        _padded_tile_bytes(N, N)
        + _padded_tile_bytes(N, F_in)
        + _padded_tile_bytes(N, F_out)
    )

    if batch_block is None:
        vmem_cap_bt = max(1, vmem_tile_budget_bytes // per_mol_bytes)
        bt = max(1, min(vmem_cap_bt, pl.cdiv(B, _TARGET_GRID_STEPS)))
        steps = pl.cdiv(B, bt)
        if steps > 1 and steps % 2 == 1:
            # Prefer an even grid so the ("parallel",) axis feeds both v7x
            # TensorCores evenly; harmless on single-TC v5e/v6e.
            steps += 1
            bt = max(1, pl.cdiv(B, steps))
        batch_block = bt

    steps = pl.cdiv(B, batch_block)
    grid = (steps,)
    B_pad = steps * batch_block

    # Non-divisible batches: pad up, compute, slice back (never grid=(1,)).
    if B_pad != B:
        pad = ((0, B_pad - B), (0, 0), (0, 0))
        nodes_p = jnp.pad(nodes, pad)
        edges_p = jnp.pad(edges, pad)
    else:
        nodes_p, edges_p = nodes, edges

    bias2d = bias.reshape(1, F_out)

    # Scoped-VMEM limit sized to the actual tiles (+resident weights/bias and
    # slack), capped well under v7x's 64 MiB physical VMEM.
    resident_bytes = 2 * (_padded_tile_bytes(F_in, F_out) + _padded_tile_bytes(1, F_out))
    vmem_limit = int(
        min(56 << 20,
            max(16 << 20, batch_block * per_mol_bytes + resident_bytes + (2 << 20)))
    )

    conv_out = pl.pallas_call(
        functools.partial(_gcn_kernel, mxu_dtype=mxu_dtype),
        out_shape=jax.ShapeDtypeStruct((B_pad, N, F_out), jnp.float32),
        grid_spec=pltpu.PrefetchScalarGridSpec(
            num_scalar_prefetch=0,
            grid=grid,
            in_specs=[
                pl.BlockSpec((batch_block, N, F_in), lambda g: (g, 0, 0)),
                pl.BlockSpec((batch_block, N, N), lambda g: (g, 0, 0)),
                pl.BlockSpec((F_in, F_out), lambda g: (0, 0)),   # resident weights
                pl.BlockSpec((1, F_out), lambda g: (0, 0)),      # resident bias
            ],
            out_specs=pl.BlockSpec((batch_block, N, F_out), lambda g: (g, 0, 0)),
        ),
        compiler_params=pltpu.CompilerParams(
            dimension_semantics=("parallel",),
            vmem_limit_bytes=vmem_limit,
        ),
    )(nodes_p, edges_p, weight, bias2d)

    if B_pad != B:
        conv_out = conv_out[:B]
    return conv_out, edges


def _reference(nodes, edges, weight, bias):
    """Pure-JAX reference of the same GCN semantics (eye / a_norm form)."""
    N = nodes.shape[1]
    eye = jnp.eye(N, dtype=nodes.dtype)[None]
    a_hat = edges + eye
    deg = jnp.sum(a_hat, axis=-1, keepdims=True)
    dinv = 1.0 / jnp.sqrt(deg)
    a_norm = dinv * a_hat * jnp.swapaxes(dinv, 1, 2)
    xw = jnp.einsum("bnf,fo->bno", nodes, weight) + bias
    return jnp.maximum(jnp.einsum("bij,bjk->bik", a_norm, xw), 0.0)


def _make_inputs(key, B, N, F_in, F_out):
    k_nodes, k_adj, k_w, k_b = jax.random.split(key, 4)
    nodes = jax.random.normal(k_nodes, (B, N, F_in), dtype=jnp.float32)
    raw = jax.random.uniform(k_adj, (B, N, N))
    adj = (raw + jnp.swapaxes(raw, 1, 2)) * 0.5
    eye = jnp.eye(N, dtype=jnp.float32)[None]
    edges = jnp.where((adj > 0.7) & (eye == 0.0), 1.0, 0.0).astype(jnp.float32)
    weight = (jax.random.normal(k_w, (F_in, F_out), dtype=jnp.float32)
              / jnp.sqrt(jnp.float32(F_in)))
    bias = jax.random.normal(k_b, (F_out,), dtype=jnp.float32) * 0.01
    return nodes, edges, weight, bias


if __name__ == "__main__":
    # Shapes consistent with the module: feat_dim=32, max_nodes=16, amplify=1.
    N, F_in = 16, 32
    F_out = F_in

    key = jax.random.PRNGKey(0)
    k1, k2 = jax.random.split(key)

    # --- Run 1: small batch, default (auto) tiling, exact f32 path. ----------
    nodes, edges, weight, bias = _make_inputs(k1, 2, N, F_in, F_out)
    conv_out, edges_out = graph_conv_featurizer_forward(nodes, edges, weight, bias)
    jax.block_until_ready(conv_out)
    jax.block_until_ready(edges_out)
    ref = _reference(nodes, edges, weight, bias)
    assert jnp.allclose(conv_out, ref, atol=1e-4, rtol=1e-4), "f32 mismatch (B=2)"
    assert jnp.array_equal(edges_out, edges)

    # --- Run 2: non-divisible batch (padding path) with explicit Bt. ---------
    nodes5, edges5, weight5, bias5 = _make_inputs(k2, 5, N, F_in, F_out)
    conv5, edges5_out = graph_conv_featurizer_forward(
        nodes5, edges5, weight5, bias5, batch_block=2)
    jax.block_until_ready(conv5)
    ref5 = _reference(nodes5, edges5, weight5, bias5)
    assert conv5.shape == (5, N, F_out)
    assert jnp.allclose(conv5, ref5, atol=1e-4, rtol=1e-4), "f32 mismatch (B=5 padded)"
    assert jnp.array_equal(edges5_out, edges5)

    # --- Run 3: bf16 MXU operands (f32 accumulate, f32 elementwise). ---------
    conv_bf16, _ = graph_conv_featurizer_forward(
        nodes5, edges5, weight5, bias5, batch_block=2, mxu_dtype=jnp.bfloat16)
    jax.block_until_ready(conv_bf16)
    assert jnp.allclose(conv_bf16, ref5, atol=1e-1, rtol=1e-2), "bf16 mismatch (loose)"

    print("KERNEL_OK")
</pallas_src>

<mosaic_0001>
module attributes {stable_mosaic.version = 11 : i64} {
  func.func @_gcn_kernel(%arg0: i32, %arg1: memref<1x16x32xf32, #tpu.memory_space<vmem>>, %arg2: memref<1x16x16xf32, #tpu.memory_space<vmem>>, %arg3: memref<32x32xf32, #tpu.memory_space<vmem>>, %arg4: memref<1x32xf32, #tpu.memory_space<vmem>>, %arg5: memref<1x16x32xf32, #tpu.memory_space<vmem>>) attributes {dimension_semantics = [#tpu.dimension_semantics<parallel>], iteration_bounds = array<i64: 2>, scalar_prefetch = 0 : i64, scratch_operands = 0 : i64, tpu.core_type = #tpu.core_type<tc>, window_params = [{transform_indices = @transform_0, window_bounds = array<i64: 1, 16, 32>}, {transform_indices = @transform_1, window_bounds = array<i64: 1, 16, 16>}, {pipeline_mode = #tpu.pipeline_mode<synchronous>, transform_indices = @transform_2, window_bounds = array<i64: 32, 32>}, {pipeline_mode = #tpu.pipeline_mode<synchronous>, transform_indices = @transform_3, window_bounds = array<i64: 1, 32>}, {transform_indices = @transform_4, window_bounds = array<i64: 1, 16, 32>}]} {
    %c0 = arith.constant 0 : index
    %c0_0 = arith.constant 0 : index
    %c0_1 = arith.constant 0 : index
    %0 = vector.load %arg1[%c0, %c0_0, %c0_1] : memref<1x16x32xf32, #tpu.memory_space<vmem>>, vector<1x16x32xf32>
    %1 = vector.shape_cast %0 : vector<1x16x32xf32> to vector<16x32xf32>
    %c0_2 = arith.constant 0 : index
    %c0_3 = arith.constant 0 : index
    %2 = vector.load %arg3[%c0_2, %c0_3] : memref<32x32xf32, #tpu.memory_space<vmem>>, vector<32x32xf32>
    %cst = arith.constant dense<0.000000e+00> : vector<16x32xf32>
    %3 = tpu.matmul %1, %2, %cst {dimension_numbers = #tpu.dot_dimension_numbers<[1], [0], [0], [1], [0, 0, 1, 1], [], []>} : vector<16x32xf32>, vector<32x32xf32>, vector<16x32xf32> -> vector<16x32xf32>
    %c0_4 = arith.constant 0 : index
    %c0_5 = arith.constant 0 : index
    %4 = vector.load %arg4[%c0_4, %c0_5] : memref<1x32xf32, #tpu.memory_space<vmem>>, vector<1x32xf32>
    %5 = vector.broadcast %4 : vector<1x32xf32> to vector<16x32xf32>
    %6 = arith.addf %3, %5 : vector<16x32xf32>
    %7 = vector.shape_cast %6 : vector<16x32xf32> to vector<1x16x32xf32>
    %c0_6 = arith.constant 0 : index
    %c0_7 = arith.constant 0 : index
    %c0_8 = arith.constant 0 : index
    %8 = vector.load %arg2[%c0_6, %c0_7, %c0_8] : memref<1x16x16xf32, #tpu.memory_space<vmem>>, vector<1x16x16xf32>
    %cst_9 = arith.constant dense<0.000000e+00> : vector<1x16xf32>
    %9 = vector.multi_reduction <add>, %8, %cst_9 [2] : vector<1x16x16xf32> to vector<1x16xf32>
    %10 = vector.shape_cast %9 : vector<1x16xf32> to vector<1x16x1xf32>
    %cst_10 = arith.constant 1.000000e+00 : f32
    %11 = vector.broadcast %cst_10 : f32 to vector<1x16x1xf32>
    %12 = arith.addf %10, %11 : vector<1x16x1xf32>
    %13 = math.rsqrt %12 : vector<1x16x1xf32>
    %14 = vector.broadcast %13 : vector<1x16x1xf32> to vector<1x16x32xf32>
    %15 = arith.mulf %14, %7 : vector<1x16x32xf32>
    "tpu.trace_start"() <{level = 10 : i32, message = "bij,bjk->bik"}> : () -> ()
    %cst_11 = arith.constant dense<0.000000e+00> : vector<1x16x32xf32>
    %16 = tpu.matmul %8, %15, %cst_11 {dimension_numbers = #tpu.dot_dimension_numbers<[2], [1], [1], [2], [0, 0, 0, 1, 1, 2], [0], [0]>} : vector<1x16x16xf32>, vector<1x16x32xf32>, vector<1x16x32xf32> -> vector<1x16x32xf32>
    "tpu.trace_stop"() : () -> ()
    %17 = arith.addf %16, %15 : vector<1x16x32xf32>
    %18 = vector.broadcast %13 : vector<1x16x1xf32> to vector<1x16x32xf32>
    %19 = arith.mulf %18, %17 : vector<1x16x32xf32>
    %cst_12 = arith.constant 0.000000e+00 : f32
    %20 = vector.broadcast %cst_12 : f32 to vector<1x16x32xf32>
    %21 = arith.maximumf %19, %20 : vector<1x16x32xf32>
    %c0_13 = arith.constant 0 : index
    %c0_14 = arith.constant 0 : index
    %c0_15 = arith.constant 0 : index
    %22 = vector.load %arg5[%c0_13, %c0_14, %c0_15] : memref<1x16x32xf32, #tpu.memory_space<vmem>>, vector<1x16x32xf32>
    tpu.vector_store %arg5[%c0_13, %c0_14, %c0_15], %21 {strides = array<i32>} : memref<1x16x32xf32, #tpu.memory_space<vmem>>, vector<1x16x32xf32>,
    return
  }
  func.func @transform_0(%arg0: i32) -> (i32, i32, i32) {
    %c0_i32 = arith.constant 0 : i32
    %c0_i32_0 = arith.constant 0 : i32
    %c0_i32_1 = arith.constant 0 : i32
    return %arg0, %c0_i32, %c0_i32_0 : i32, i32, i32
  }
  func.func @transform_1(%arg0: i32) -> (i32, i32, i32) {
    %c0_i32 = arith.constant 0 : i32
    %c0_i32_0 = arith.constant 0 : i32
    %c0_i32_1 = arith.constant 0 : i32
    return %arg0, %c0_i32, %c0_i32_0 : i32, i32, i32
  }
  func.func @transform_2(%arg0: i32) -> (i32, i32) {
    %c0_i32 = arith.constant 0 : i32
    %c0_i32_0 = arith.constant 0 : i32
    %c0_i32_1 = arith.constant 0 : i32
    return %c0_i32, %c0_i32_0 : i32, i32
  }
  func.func @transform_3(%arg0: i32) -> (i32, i32) {
    %c0_i32 = arith.constant 0 : i32
    %c0_i32_0 = arith.constant 0 : i32
    %c0_i32_1 = arith.constant 0 : i32
    return %c0_i32, %c0_i32_0 : i32, i32
  }
  func.func @transform_4(%arg0: i32) -> (i32, i32, i32) {
    %c0_i32 = arith.constant 0 : i32
    %c0_i32_0 = arith.constant 0 : i32
    %c0_i32_1 = arith.constant 0 : i32
    return %arg0, %c0_i32, %c0_i32_0 : i32, i32, i32
  }
}

</mosaic_0001>

<bundles_post_ra>
// kernel: tpu_custom_call.1
= control target key start
LH: loop header
LB: loop body
LE: loop exit
PB: predicated region body
PF: predicated region fallthrough
CT: control target
= control target key end

     0   :  { %s1190_s0 = inlined_call_operand.hbm [shape: f32[2,16,32], index: 0, kind: input, shape index: {}]   ;;  %s1191_s1 = inlined_call_operand.hbm [shape: f32[2,16,16], index: 1, kind: input, shape index: {}]   ;;  %s1192_s2 = inlined_call_operand.hbm [shape: f32[32,32], index: 2, kind: input, shape index: {}]   ;;  %s1193_s3 = inlined_call_operand.vmem [shape: f32[1,32], index: 3, kind: input, shape index: {}]   ;;  %s1194_s4 = inlined_call_operand.hbm [shape: f32[2,16,32], index: 4, kind: output, shape index: {}]  }
   0x1   :  { %1202 = sst [smem:[#allocation14_spill]] %s1190_s0 }
   0x2   :  { %1203 = sst [smem:[#allocation15_spill]] %s1192_s2 }
   0x3   :  { %9 = vsyncpa [#allocation3], 0 }
   0x4   :  { %11 = vsyncpa [#allocation3 + $0x1], 0 }
   0x5   :  { %12 = vsyncpa [#allocation6], 0 }
   0x6   :  { %14 = vsyncpa [#allocation6 + $0x1], 0 }
   0x7   :  { %15 = vsyncpa [#allocation4], 0 }
   0x8   :  { %17 = vsyncpa [#allocation4 + $0x1], 0  ;;  %s921_s15 = smov 0   ;;  %s923_s16 = smov 0  }
   0x9   :  { %s925_s17 = smov 0   ;;  %s927_s18 = smov 0  }
   0xa LB: > { %s942_s19 = sadd.s32 4294967295, %s886_s18   ;;  %s586_s20 = sadd.s32 4294967294, %s886_s18   ;;  %s886_s18 = sphi %s927_s18, %s1226_s18   ;;  %s882_s17 = sphi %s925_s17, %s1225_s17   ;;  %s878_s16 = sphi %s923_s16, %s1224_s16   ;;  %s874_s15 = sphi %s921_s15, %s1223_s15  }
   0xb   : > { %p43_p0 = scmp.ne.s32.totalorder %s878_s16, %s874_s15  ;;  %p1195_p1 = scmp.eq.s32.totalorder %s942_s19, 0 }
   0xc   : > { %p141_p3 = scmp.eq.s32.totalorder %s586_s20, 1  ;;  %p587_p5 = scmp.ge.s32.totalorder %s886_s18, 1 }
   0xd   : > { %p951_p4 = por %p1195_p1, %p43_p0  ;;  %p148_p7 = scmp.lt.s32.totalorder %s886_s18, 3 }
   0xe   : > { %p956_p6 = por %p141_p3, %p43_p0  ;;  %s888_s24 = smov [#allocation7]  }
   0xf   : > { %s1204_s21 = scalar_select %p951_p4, 1, 0 }
  0x10   : > { %s1205_s22 = scalar_select %p956_p6, 1, 0 }
  0x11   : > { %p961_p8 = pnand %p587_p5, %p148_p7  ;;  %s160_s25 = sshll.u32 %s888_s24, 4  ;;  %s965_s25 = int_to_ptr.vmem [resolvable:$true] %s160_s25 }
  0x12   : > { %s977_s27 = sadd.s32 1, %s886_s18   ;;  %s30_s28 = sadd.s32 1, %s882_s17 }
  0x13   : > { %s1206_s23 = scalar_select %p961_p8, 1, 0 }
  0x14   : > { %p664_p9 = pneg %p961_p8  ;;  %s27_s29 = ssub.s32 %s886_s18, %s977_s27 }
  0x15   : > { %s1208_s2 = sld [smem:[#allocation15_spill]] }
  0x16   : > { %p972_p11 = pnand %p664_p9, %p1195_p1 }
  0x18   : > { %p726_p13 = pneg %p972_p11 }
  0x1b   : > { %s724_s6 = scalar_lea.hbm %s1208_s2, 512 }
  0x1c   : > { %p725_p12 = scmp.ne.s32.totalorder %s1208_s2, %s724_s6  ;;  %p731_p5 = scmp.lt.u32.totalorder %s724_s6, %s1208_s2 }
  0x1e   : > { %p727_p0 = pnand %p726_p13, %p725_p12 }
  0x20   : > { %p728_p3 = pneg %p727_p0 }
  0x22   : > { %p733_p7 = pnand %p731_p5, %p728_p3 }
  0x24   : > { %736 = shalt.err (!%p733_p7)
}
  0x25   : > { %s737_s11 = scalar_lea.vmem %s965_s25, 512  ;;  %p745_p2 = scmp.lt.s32.totalorder %s965_s25, %s965_s25 }
  0x26   : > { %p738_p9 = scmp.ne.s32.totalorder %s965_s25, %s737_s11  ;;  %p746_p6 = scmp.lt.s32.totalorder %s737_s11, %s737_s11 }
  0x28   : > { %p740_p10 = pnand %p738_p9, %p726_p13  ;;  %p747_p4 = por %p746_p6, %p745_p2 }
  0x2a   : > { %p741_p1 = pneg %p740_p10 }
  0x2c   : > { %p748_p8 = pnand %p747_p4, %p741_p1 }
  0x2e   : > { %751 = shalt.err (!%p748_p8)
}
  0x2f   : > { %s1198_s12 = smov 128   ;;  %s1200_s13 = smov 8  }
  0x30   : > { %667 = dma.hbm_to_vmem [thread:$0]  (!%p972_p11), %s1208_s2, 512, %s965_s25, [#allocation6], %s1198_s12, %s1198_s12, %s1200_s13  }
  0x31   : > { %p28_p1 = scmp.eq.s32.totalorder %s27_s29, 0  ;;  %p37_p2 = scmp.ne.s32.totalorder %s882_s17, %s878_s16 }
  0x32   : > { %p38_p4 = scmp.eq.s32.totalorder %s886_s18, 0  ;;  %p680_p6 = scmp.lt.s32.totalorder %s886_s18, 2 }
  0x33   : > { %s1011_s24 = scalar_select %p28_p1, %s882_s17, %s30_s28  }
  0x34   : > { %p39_p8 = por %p38_p4, %p37_p2  ;;  %p1210_p10 = scmp.eq.s32.totalorder %s942_s19, 1 }
  0x35   : > { %1209 = sst [smem:[#allocation13_spill]] %s1011_s24  ;;  %s177_s26 = sand.u32 1, %s882_s17  }
  0x36   : > { %p1015_p12 = por %p1210_p10, %p37_p2  ;;  %s611_s5 = sshll.u32 %s886_s18, 8 }
  0x37   : > { %s1021_s6 = sshll.u32 %s177_s26, 4  ;;  %s1212_s0 = sld [smem:[#allocation14_spill]] }
  0x38   : > { %s181_s28 = scalar_lea.vmem [#allocation2], %s1021_s6  ;;  %p1029_p11 = pnand %p680_p6, %p39_p8 }
  0x39   : > { %s188_s29 = sshll.u32 %s181_s28, 4  ;;  %s1038_s14 = scalar_lea.hbm %s1191_s1, %s611_s5  ;;  %s1033_s29 = int_to_ptr.vmem [resolvable:$true] %s188_s29 }
  0x3a   : > { %s1040_s20 = scalar_lea.sflag [#allocation3], %s177_s26  ;;  %p754_p0 = pneg %p1029_p11 }
  0x3d   : > { %s1026_s25 = scalar_lea.hbm %s1212_s0, %s611_s5  ;;  %s757_s12 = scalar_lea.hbm %s1212_s0, 512 }
  0x3e   : > { %s752_s7 = scalar_lea.hbm %s1026_s25, 256  ;;  %p758_p7 = scmp.lt.u32.totalorder %s1026_s25, %s1212_s0 }
  0x3f   : > { %p753_p13 = scmp.ne.s32.totalorder %s1026_s25, %s752_s7  ;;  %p759_p9 = scmp.lt.u32.totalorder %s757_s12, %s752_s7 }
  0x40   : > { %p761_p2 = scmp.lt.u32.totalorder %s752_s7, %s1026_s25 }
  0x41   : > { %p755_p3 = pnand %p754_p0, %p753_p13  ;;  %p760_p1 = por %p759_p9, %p758_p7 }
  0x43   : > { %p756_p5 = pneg %p755_p3  ;;  %p762_p4 = por %p761_p2, %p760_p1 }
  0x45   : > { %p763_p6 = pnand %p762_p4, %p756_p5 }
  0x47   : > { %766 = shalt.err (!%p763_p6)
}
  0x48   : > { %s767_s26 = scalar_lea.vmem %s1033_s29, 256  ;;  %s891_s5 = smov [#allocation2]  }
  0x49   : > { %p768_p8 = scmp.ne.s32.totalorder %s1033_s29, %s767_s26  ;;  %s772_s10 = sshll.u32 %s891_s5, 4  ;;  %s773_s10 = int_to_ptr.vmem [resolvable:$false] %s772_s10 }
  0x4a   : > { %s774_s2 = scalar_lea.vmem %s773_s10, 512  ;;  %p775_p3 = scmp.lt.s32.totalorder %s1033_s29, %s773_s10 }
  0x4b   : > { %p770_p10 = pnand %p768_p8, %p754_p0  ;;  %p776_p7 = scmp.lt.s32.totalorder %s774_s2, %s767_s26 }
  0x4d   : > { %p771_p13 = pneg %p770_p10  ;;  %p777_p9 = por %p776_p7, %p775_p3 }
  0x4f   : > { %p778_p1 = pnand %p777_p9, %p771_p13 }
  0x51   : > { %781 = shalt.err (!%p778_p1)
}
  0x52   : > { %s1214_s12 = smov 8   ;;  %s1215_s13 = smov 128  }
  0x53   : > { %671 = dma.hbm_to_vmem [thread:$0]  (!%p1029_p11), %s1026_s25, 256, %s1033_s29, %s1040_s20, %s1215_s13, %s1215_s13, %s1214_s12  }
  0x54   : > { %s202_s11 = scalar_lea.vmem [#allocation5], %s1021_s6  ;;  %s198_s8 = sand.u32 1, %s886_s18  }
  0x55   : > { %s209_s7 = sshll.u32 %s202_s11, 4  ;;  %s1075_s28 = scalar_lea.sflag [#allocation6], %s198_s8  ;;  %s1073_s7 = int_to_ptr.vmem [resolvable:$true] %s209_s7 }
  0x56   : > { %s782_s26 = scalar_lea.hbm %s1038_s14, 256  ;;  %s787_s2 = scalar_lea.hbm %s1191_s1, 512 }
  0x57   : > { %p783_p5 = scmp.ne.s32.totalorder %s1038_s14, %s782_s26  ;;  %p788_p6 = scmp.lt.u32.totalorder %s1038_s14, %s1191_s1 }
  0x58   : > { %p789_p8 = scmp.lt.u32.totalorder %s787_s2, %s782_s26  ;;  %p791_p13 = scmp.lt.u32.totalorder %s782_s26, %s1038_s14 }
  0x59   : > { %p785_p2 = pnand %p783_p5, %p754_p0 }
  0x5a   : > { %p790_p10 = por %p789_p8, %p788_p6 }
  0x5b   : > { %p786_p4 = pneg %p785_p2 }
  0x5c   : > { %p792_p3 = por %p791_p13, %p790_p10 }
  0x5e   : > { %p793_p7 = pnand %p792_p3, %p786_p4 }
  0x60   : > { %796 = shalt.err (!%p793_p7)
}
  0x61   : > { %s797_s6 = scalar_lea.vmem %s1073_s7, 256  ;;  %s892_s25 = smov [#allocation5]  }
  0x62   : > { %p798_p9 = scmp.ne.s32.totalorder %s1073_s7, %s797_s6  ;;  %s802_s29 = sshll.u32 %s892_s25, 4  ;;  %s803_s29 = int_to_ptr.vmem [resolvable:$false] %s802_s29 }
  0x63   : > { %s804_s0 = scalar_lea.vmem %s803_s29, 512  ;;  %p805_p2 = scmp.lt.s32.totalorder %s1073_s7, %s803_s29 }
  0x64   : > { %p800_p1 = pnand %p798_p9, %p754_p0  ;;  %p806_p6 = scmp.lt.s32.totalorder %s804_s0, %s797_s6 }
  0x66   : > { %p801_p5 = pneg %p800_p1  ;;  %p807_p8 = por %p806_p6, %p805_p2 }
  0x68   : > { %p808_p10 = pnand %p807_p8, %p801_p5 }
  0x6a   : > { %811 = shalt.err (!%p808_p10)
}
  0x6b   : > { %674 = dma.hbm_to_vmem [thread:$0]  (!%p1029_p11), %s1038_s14, 256, %s1073_s7, %s1075_s28, %s1215_s13, %s1215_s13, %s1214_s12  }
  0x6c   : > { %p1216_p0 = scmp.ne.s32.totalorder %s1206_s23, 0 }
  0x6d   : > { %s1107_s24 = sand.u32 (!%p1216_p0), 1, %s878_s16   ;;  %p1217_p4 = scmp.ne.s32.totalorder (!%p1216_p0), %s1204_s21, 0 }
  0x6e   : > { %221 = sbr.rel (%p1216_p0) target bundleno = 592 (0x250), region = 36  ;;  %s1110_s20 = sshll.u32 (!%p1216_p0), %s1107_s24, 4 }
  0x6f   : > { %s224_s9 = scalar_lea.sflag (!%p1216_p0), [#allocation3], %s1107_s24  ;;  %s227_s11 = scalar_lea.vmem (!%p1216_p0), [#allocation2], %s1110_s20 }
  0x75   : > { %857 = dma.done.wait (%p1217_p4), %s224_s9, 256  }
  0x76   : > { %859 = vsyncadd (%p1217_p4), %s224_s9, 4294967040  ;;  %s232_s23 = sand.u32 1, %s942_s19   ;;  %s236_s12 = scalar_lea.vmem [#allocation5], %s1110_s20 }
  0x77   : > { %s233_s14 = scalar_lea.sflag [#allocation6], %s232_s23 }
  0x78   : > { %861 = dma.done.wait (%p1217_p4), %s233_s14, 256  }
  0x79   : > { %863 = vsyncadd (%p1217_p4), %s233_s14, 4294967040  ;;  %p1218_p11 = scmp.eq.s32.totalorder %s942_s19, 0 }
  0x7b   : > { %865 = dma.done.wait (%p1218_p11), [#allocation6], 512   ;;  %p1219_p13 = pmov %p1218_p11 }
  0x7c   : > { %vm283_vm0 = vcmask 261120   ;;  %v272_v0 = vld [vmem:[#allocation7] sm:$0xff]  ;;  %v273_v1 = vld [vmem:[#allocation7 + $0x8] sm:$0xff]  ;;  %v274_v2 = vld [vmem:[#allocation7 + $0x10] sm:$0xff]  ;;  %vm367_vm1 = vcmask 130048   ;;  %s613_s7 = sshll.u32 %s942_s19, 8 }
  0x7d   : > { %867 = vsyncadd (%p1219_p13), [#allocation6], 4294966784  ;;  %v642_v3 = vpack.c.bf16 %v273_v1, %v272_v0  ;;  %v275_v4 = vld [vmem:[#allocation7 + $0x18] sm:$0xff]  ;;  %v270_v5 = vld [vmem:[%s227_s11] sm:$0xff]  ;;  %s269_s8 = scalar_lea.vmem [#allocation8], %s1110_s20  ;;  %s1142_s10 = scalar_lea.hbm %s1194_s4, %s613_s7 }
  0x7e   : > { %v646_v6 = vpack.c.bf16 %v275_v4, %v274_v2  ;;  %632 = vmatprep.mubr.msk.f32.mxu0 %vm283_vm0, %v270_v5  ;;  %v365_v7 = vld [vmem:[%s236_s12] sm:$0xff]  ;;  %v366_v8 = vld [vmem:[%s236_s12 + $0x8] sm:$0xff]  ;;  %s481_s28 = sshll.u32 %s269_s8, 4  ;;  %s468_s19 = scalar_lea.sflag [#allocation4], %s1107_s24  ;;  %s1144_s28 = int_to_ptr.vmem [resolvable:$true] %s481_s28 }
  0x7f   : > { %643 = vmatprep.subr.bf16.mxu0 %v642_v3  ;;  %v368_v9 = vsel %vm367_vm1, %v365_v7, 0.0  ;;  %639 = vmatprep.mubr.msk.f32.mxu1 %vm367_vm1, %v365_v7  ;;  %v371_v10 = vsel %vm367_vm1, %v366_v8, 0.0  ;;  %v271_v11 = vld [vmem:[%s227_s11 + $0x8] sm:$0xff]  ;;  %v601_v16 = vld [vmem:[%s1193_s3] ss:$0 sm:$0xff]  ;;  %s812_s2 = scalar_lea.vmem %s1144_s28, 256 }
  0x80   : > { %645 = vmatpush3.bf16.msra.mxu0 %v642_v3  ;;  %369 = vadd.xlane.f32.xlu0 %v368_v9  ;;  %p813_p3 = scmp.ne.s32.totalorder %s1144_s28, %s812_s2  ;;  %s893_s6 = smov [#allocation8]  }
  0x81   : > { %647 = vmatprep.subr.bf16.mxu0 %v646_v6  ;;  %s816_s25 = sshll.u32 %s893_s6, 4  ;;  %s817_s25 = int_to_ptr.vmem [resolvable:$false] %s816_s25 }
  0x82   : > { %p814_p7 = pnand %p813_p3, %p1015_p12  ;;  %s818_s29 = scalar_lea.vmem %s817_s25, 512 }
  0x83   : > { %p819_p1 = scmp.lt.s32.totalorder %s1144_s28, %s817_s25  ;;  %p820_p5 = scmp.lt.s32.totalorder %s818_s29, %s812_s2 }
  0x84   : > { %649 = vmatpush3.bf16.msra.mxu0 %v646_v6  ;;  %372 = vadd.xlane.f32.xlu0 %v371_v10  ;;  %p815_p9 = pneg %p814_p7 }
  0x85   : > { %p821_p2 = por %p820_p5, %p819_p1 }
  0x87   : > { %633 = vmatmul.mubr.msk.f32.vlgmr.msra.gmra.mrb[0].mxu0 %vm283_vm0, %v271_v11  ;;  %p822_p6 = pnand %p821_p2, %p815_p9 }
 0x10d   : > { %v370_v12 = vpop.xlane.xlu0 %369 }
 0x10e   : > { %v374_v15 = vadd.f32 1.0, %v370_v12 }
 0x111   : > { %v373_v13 = vpop.xlane.xlu0 %372 }
 0x112   : > { %v375_v14 = vadd.f32 1.0, %v373_v13 }
 0x114   : > { %720 = vrsqrt.f32 %v375_v14 }
 0x115   : > { %722 = vrsqrt.f32 %v374_v15 }
 0x11e   : > { %v721_v17 = vpop.eup %720 }
 0x11f   : > { %v723_v22 = vpop.eup %722 }
 0x15a   : > { %v634_v18 = vpop.f32.mrb[0].mxu0 }
 0x15b   : > { %v362_v19 = vadd.f32 %v634_v18, %v601_v16  ;;  %v356_v20 = vpop.f32.mrb[1].mxu0 }
 0x15c   : > { %v357_v21 = vadd.f32 %v601_v16, %v356_v20 }
 0x15d   : > { %v379_v23 = vmul.f32 %v721_v17, %v362_v19 }
 0x15e   : > { %v378_v24 = vmul.f32 %v723_v22, %v357_v21 }
 0x160   : > { %v650_v25 = vpack.c.bf16 %v379_v23, %v378_v24 }
 0x162   : > { %651 = vmatprep.subr.bf16.mxu1 %v650_v25 }
 0x163   : > { %653 = vmatpush3.bf16.msra.mxu1 %v650_v25 }
 0x166   : > { %640 = vmatmul.mubr.msk.f32.vlgmr.msra.gmra.mrb[0].mxu1 %vm367_vm1, %v366_v8 }
 0x239   : > { %v641_v26 = vpop.f32.mrb[0].mxu1 }
 0x23a   : > { %v458_v27 = vadd.f32 %v641_v26, %v379_v23  ;;  %v452_v28 = vpop.f32.mrb[1].mxu1 }
 0x23b   : > { %v453_v29 = vadd.f32 %v452_v28, %v378_v24 }
 0x23c   : > { %v462_v30 = vmul.f32 %v721_v17, %v458_v27 }
 0x23d   : > { %v461_v31 = vmul.f32 %v723_v22, %v453_v29 }
 0x23e   : > { %v464_v32 = vmax.f32 %v462_v30, 0.0 }
 0x23f   : > { %v463_v33 = vmax.f32 %v461_v31, 0.0 }
 0x240   : > { %466 = vst.msk [vmem:[%s269_s8 + $0x8] sm:$0xff] %vm283_vm0, %v464_v32 }
 0x241   : > { %465 = vst.msk [vmem:[%s269_s8] sm:$0xff] %vm283_vm0, %v463_v33 }
 0x242   : > { %825 = shalt.err (!%p822_p6)
}
 0x243   : > { %s826_s0 = scalar_lea.hbm %s1142_s10, 256  ;;  %s830_s11 = scalar_lea.hbm %s1194_s4, 512 }
 0x244   : > { %p827_p8 = scmp.ne.s32.totalorder %s1142_s10, %s826_s0  ;;  %p831_p4 = scmp.lt.u32.totalorder %s1142_s10, %s1194_s4 }
 0x245   : > { %p832_p11 = scmp.lt.u32.totalorder %s830_s11, %s826_s0  ;;  %p834_p3 = scmp.lt.u32.totalorder %s826_s0, %s1142_s10 }
 0x246   : > { %p828_p10 = pnand %p827_p8, %p1015_p12 }
 0x247   : > { %p833_p13 = por %p832_p11, %p831_p4 }
 0x248   : > { %p829_p0 = pneg %p828_p10 }
 0x249   : > { %p835_p7 = por %p834_p3, %p833_p13 }
 0x24b   : > { %p836_p9 = pnand %p835_p7, %p829_p0 }
 0x24d   : > { %839 = shalt.err (!%p836_p9)
}
 0x24e   : > { %s894_s12 = smov 128   ;;  %s895_s21 = smov 8  }
 0x24f   : > { %662 = dma.vmem_to_hbm [thread:$0]  (%p1015_p12), %s1144_s28, 256, %s1142_s10, %s468_s19, %s894_s12, %s894_s12, %s895_s21  }
 0x250 PF: > { %s496_s13 = sand.u32 1, %s874_s15   ;;  %p1220_p1 = scmp.ne.s32.totalorder %s1205_s22, 0 }
 0x251   : > { %p1221_p5 = scmp.ge.s32.totalorder %s886_s18, 2  ;;  %s497_s7 = scalar_lea.sflag [#allocation4], %s496_s13 }
 0x253   : > { %p676_p2 = pnand %p1221_p5, %p1220_p1 }
 0x255   : > { %869 = dma.done.wait (!%p676_p2), %s497_s7, 256  }
 0x256   : > { %871 = vsyncadd (!%p676_p2), %s497_s7, 4294967040  ;;  %s1222_s8 = sld [smem:[#allocation13_spill]]  ;;  %p20_p6 = scmp.ge.s32.totalorder %s977_s27, 4  }
 0x257   : > { %s1223_s15 = smov %s878_s16  ;;  %s1224_s16 = smov %s882_s17 }
 0x258   : > { %s1226_s18 = smov %s977_s27  ;;  %22 = sbr.rel (!%p20_p6) target bundleno = 10 (0xa), region = 98 }
 0x25c   : > { %s1225_s17 = smov %s1222_s8 }
 0x25f   :  { %502 = vsyncpa [#allocation3], 1 }
 0x260   :  { %504 = vsyncpa [#allocation3 + $0x1], 1 }
 0x261   :  { %505 = vsyncpa [#allocation6], 1 }
 0x262   :  { %507 = vsyncpa [#allocation6 + $0x1], 1 }
 0x263   :  { %508 = vsyncpa [#allocation4], 1 }
 0x264   :  { %510 = vsyncpa [#allocation4 + $0x1], 1 }

</bundles_post_ra>
